<compile_context>
chip_gen: v7x
topology: tpu7x:2x2x1
jax: 0.10.0
libtpu: 0.0.40
codegen_flags: <defaults>
</compile_context>

<pallas_src>
import functools

import jax
import jax.numpy as jnp
from jax.experimental import pallas as pl
from jax.experimental.pallas import tpu as pltpu


def _erode_kernel(x_ref, o_ref, s1_ref, s2_ref, *, kh, kw, border):
    """Separable (kh, kw) min-filter with in-kernel border handling.

    x_ref / o_ref : (nb, H, W) blocks in VMEM (W on lanes, H on sublanes).
    s1_ref        : (nb, H + kh - 1, W)      sublane-padded temp.
    s2_ref        : (nb, H, W + kw - 1)      lane-padded temp.
    """
    nb, H, W = x_ref.shape
    ay, ax = kh // 2, kw // 2            # cv2 default anchor = kernel center
    bh, bw = kh - 1 - ay, kw - 1 - ax
    dt = o_ref.dtype

    # --- stage the tile into a sublane-padded temp (border rows = +inf) ----
    if ay > 0:
        s1_ref[:, 0:ay, :] = jnp.full((nb, ay, W), border, dtype=dt)
    if bh > 0:
        s1_ref[:, ay + H:ay + H + bh, :] = jnp.full((nb, bh, W), border, dtype=dt)
    s1_ref[:, ay:ay + H, :] = x_ref[...]

    # --- vertical pass: kh - 1 minimums over sublane-shifted slices --------
    vmin = s1_ref[:, 0:H, :]
    for dy in range(1, kh):
        vmin = jnp.minimum(vmin, s1_ref[:, dy:dy + H, :])

    # --- stage the reduced temp into a lane-padded temp (border cols = inf)
    if ax > 0:
        s2_ref[:, :, 0:ax] = jnp.full((nb, H, ax), border, dtype=dt)
    if bw > 0:
        s2_ref[:, :, ax + W:ax + W + bw] = jnp.full((nb, H, bw), border, dtype=dt)
    s2_ref[:, :, ax:ax + W] = vmin

    # --- horizontal pass: kw - 1 minimums over lane-shifted slices ---------
    out = s2_ref[:, :, 0:W]
    for dx in range(1, kw):
        out = jnp.minimum(out, s2_ref[:, :, dx:dx + W])

    o_ref[...] = out


def _pick_batch_block(n, per_img_bytes, *, budget_bytes=1 << 20, min_steps=4):
    """Largest divisor of n that keeps a block under `budget_bytes` while
    (when possible) leaving >= min_steps grid steps for software pipelining."""
    cap = max(1, budget_bytes // max(per_img_bytes, 1))
    if n >= min_steps:
        cap = min(cap, n // min_steps)
    nb = 1
    for d in range(1, n + 1):
        if n % d == 0 and d <= cap:
            nb = d
    return nb


def erode(x, kernel=(3, 3)):
    """Pallas equivalent of Erode(kernel).forward(x).

    x: (H, W) single image or (N, H, W) batch; floating or integer dtype.
    """
    kh, kw = int(kernel[0]), int(kernel[1])
    squeeze = x.ndim == 2
    if squeeze:
        x = x[None]
    N, H, W = x.shape

    if jnp.issubdtype(x.dtype, jnp.floating):
        border = float("inf")
    else:
        border = int(jnp.iinfo(x.dtype).max)

    itemsize = jnp.dtype(x.dtype).itemsize
    nb = _pick_batch_block(N, H * W * itemsize)
    grid = (N // nb,)

    kern = functools.partial(_erode_kernel, kh=kh, kw=kw, border=border)
    cost = pl.CostEstimate(
        flops=(kh + kw - 2) * N * H * W,
        transcendentals=0,
        bytes_accessed=2 * N * H * W * itemsize,
    )

    out = pl.pallas_call(
        kern,
        out_shape=jax.ShapeDtypeStruct((N, H, W), x.dtype),
        grid_spec=pltpu.PrefetchScalarGridSpec(
            num_scalar_prefetch=0,
            grid=grid,
            in_specs=[pl.BlockSpec((nb, H, W), lambda i: (i, 0, 0))],
            out_specs=pl.BlockSpec((nb, H, W), lambda i: (i, 0, 0)),
            scratch_shapes=[
                pltpu.VMEM((nb, H + kh - 1, W), x.dtype),
                pltpu.VMEM((nb, H, W + kw - 1), x.dtype),
            ],
        ),
        compiler_params=pltpu.CompilerParams(
            dimension_semantics=("parallel",),
        ),
        cost_estimate=cost,
    )(x)
    return out[0] if squeeze else out


def _erode_ref(x, kernel):
    """Pure-JAX reference (lax.reduce_window min) for verification."""
    kh, kw = kernel
    ay, ax = kh // 2, kw // 2
    return jax.lax.reduce_window(
        x,
        jnp.inf,
        jax.lax.min,
        window_dimensions=(1, kh, kw),
        window_strides=(1, 1, 1),
        padding=[(0, 0), (ay, kh - 1 - ay), (ax, kw - 1 - ax)],
    )


if __name__ == "__main__":
    key = jax.random.PRNGKey(0)
    cases = [
        ((2, 16, 16), (3, 3)),    # tiny images: packed nb=2 per block
        ((4, 32, 128), (3, 3)),   # lane-dense W=128, 4 parallel grid steps
        ((4, 32, 128), (5, 5)),   # larger structuring element
    ]
    for idx, (shape, kern) in enumerate(cases):
        x = jax.random.uniform(jax.random.fold_in(key, idx), shape,
                               dtype=jnp.float32)
        out = jax.block_until_ready(erode(x, kern))
        ref = _erode_ref(x, kern)
        assert out.shape == shape and out.dtype == x.dtype
        assert jnp.allclose(out, ref), (
            f"Pallas erode mismatch for shape={shape}, kernel={kern}")
    print("KERNEL_OK")
</pallas_src>

<mosaic_0001>
module attributes {stable_mosaic.version = 11 : i64} {
  func.func @_erode_kernel(%arg0: i32, %arg1: memref<2x16x16xf32, #tpu.memory_space<vmem>>, %arg2: memref<2x16x16xf32, #tpu.memory_space<vmem>>, %arg3: memref<2x18x16xf32, #tpu.memory_space<vmem>>, %arg4: memref<2x16x18xf32, #tpu.memory_space<vmem>>) attributes {dimension_semantics = [#tpu.dimension_semantics<parallel>], iteration_bounds = array<i64: 1>, scalar_prefetch = 0 : i64, scratch_operands = 2 : i64, tpu.core_type = #tpu.core_type<tc>, window_params = [{transform_indices = @transform_0, window_bounds = array<i64: 2, 16, 16>}, {transform_indices = @transform_1, window_bounds = array<i64: 2, 16, 16>}]} {
    %cst = arith.constant 0x7F800000 : f32
    %0 = vector.broadcast %cst : f32 to vector<2x1x16xf32>
    %c0 = arith.constant 0 : index
    %c0_0 = arith.constant 0 : index
    %c0_1 = arith.constant 0 : index
    %1 = vector.load %arg3[%c0, %c0_0, %c0_1] : memref<2x18x16xf32, #tpu.memory_space<vmem>>, vector<2x1x16xf32>
    tpu.vector_store %arg3[%c0, %c0_0, %c0_1], %0 {strides = array<i32>} : memref<2x18x16xf32, #tpu.memory_space<vmem>>, vector<2x1x16xf32>,
    %cst_2 = arith.constant 0x7F800000 : f32
    %2 = vector.broadcast %cst_2 : f32 to vector<2x1x16xf32>
    %c0_3 = arith.constant 0 : index
    %c17 = arith.constant 17 : index
    %c0_4 = arith.constant 0 : index
    %3 = vector.load %arg3[%c0_3, %c17, %c0_4] : memref<2x18x16xf32, #tpu.memory_space<vmem>>, vector<2x1x16xf32>
    tpu.vector_store %arg3[%c0_3, %c17, %c0_4], %2 {strides = array<i32>} : memref<2x18x16xf32, #tpu.memory_space<vmem>>, vector<2x1x16xf32>,
    %c0_5 = arith.constant 0 : index
    %c0_6 = arith.constant 0 : index
    %c0_7 = arith.constant 0 : index
    %4 = vector.load %arg1[%c0_5, %c0_6, %c0_7] : memref<2x16x16xf32, #tpu.memory_space<vmem>>, vector<2x16x16xf32>
    %c0_8 = arith.constant 0 : index
    %c1 = arith.constant 1 : index
    %c0_9 = arith.constant 0 : index
    %5 = vector.load %arg3[%c0_8, %c1, %c0_9] : memref<2x18x16xf32, #tpu.memory_space<vmem>>, vector<2x16x16xf32>
    tpu.vector_store %arg3[%c0_8, %c1, %c0_9], %4 {strides = array<i32>} : memref<2x18x16xf32, #tpu.memory_space<vmem>>, vector<2x16x16xf32>,
    %c0_10 = arith.constant 0 : index
    %c0_11 = arith.constant 0 : index
    %c0_12 = arith.constant 0 : index
    %6 = vector.load %arg3[%c0_10, %c0_11, %c0_12] : memref<2x18x16xf32, #tpu.memory_space<vmem>>, vector<2x16x16xf32>
    %c0_13 = arith.constant 0 : index
    %c1_14 = arith.constant 1 : index
    %c0_15 = arith.constant 0 : index
    %7 = vector.load %arg3[%c0_13, %c1_14, %c0_15] : memref<2x18x16xf32, #tpu.memory_space<vmem>>, vector<2x16x16xf32>
    %8 = arith.minimumf %6, %7 : vector<2x16x16xf32>
    %c0_16 = arith.constant 0 : index
    %c2 = arith.constant 2 : index
    %c0_17 = arith.constant 0 : index
    %9 = vector.load %arg3[%c0_16, %c2, %c0_17] : memref<2x18x16xf32, #tpu.memory_space<vmem>>, vector<2x16x16xf32>
    %10 = arith.minimumf %8, %9 : vector<2x16x16xf32>
    %cst_18 = arith.constant 0x7F800000 : f32
    %11 = vector.broadcast %cst_18 : f32 to vector<2x16x1xf32>
    %c0_19 = arith.constant 0 : index
    %c0_20 = arith.constant 0 : index
    %c0_21 = arith.constant 0 : index
    %12 = vector.load %arg4[%c0_19, %c0_20, %c0_21] : memref<2x16x18xf32, #tpu.memory_space<vmem>>, vector<2x16x1xf32>
    tpu.vector_store %arg4[%c0_19, %c0_20, %c0_21], %11 {strides = array<i32>} : memref<2x16x18xf32, #tpu.memory_space<vmem>>, vector<2x16x1xf32>,
    %cst_22 = arith.constant 0x7F800000 : f32
    %13 = vector.broadcast %cst_22 : f32 to vector<2x16x1xf32>
    %c0_23 = arith.constant 0 : index
    %c0_24 = arith.constant 0 : index
    %c17_25 = arith.constant 17 : index
    %14 = vector.load %arg4[%c0_23, %c0_24, %c17_25] : memref<2x16x18xf32, #tpu.memory_space<vmem>>, vector<2x16x1xf32>
    tpu.vector_store %arg4[%c0_23, %c0_24, %c17_25], %13 {strides = array<i32>} : memref<2x16x18xf32, #tpu.memory_space<vmem>>, vector<2x16x1xf32>,
    %c0_26 = arith.constant 0 : index
    %c0_27 = arith.constant 0 : index
    %c1_28 = arith.constant 1 : index
    %15 = vector.load %arg4[%c0_26, %c0_27, %c1_28] : memref<2x16x18xf32, #tpu.memory_space<vmem>>, vector<2x16x16xf32>
    tpu.vector_store %arg4[%c0_26, %c0_27, %c1_28], %10 {strides = array<i32>} : memref<2x16x18xf32, #tpu.memory_space<vmem>>, vector<2x16x16xf32>,
    %c0_29 = arith.constant 0 : index
    %c0_30 = arith.constant 0 : index
    %c0_31 = arith.constant 0 : index
    %16 = vector.load %arg4[%c0_29, %c0_30, %c0_31] : memref<2x16x18xf32, #tpu.memory_space<vmem>>, vector<2x16x16xf32>
    %c0_32 = arith.constant 0 : index
    %c0_33 = arith.constant 0 : index
    %c1_34 = arith.constant 1 : index
    %17 = vector.load %arg4[%c0_32, %c0_33, %c1_34] : memref<2x16x18xf32, #tpu.memory_space<vmem>>, vector<2x16x16xf32>
    %18 = arith.minimumf %16, %17 : vector<2x16x16xf32>
    %c0_35 = arith.constant 0 : index
    %c0_36 = arith.constant 0 : index
    %c2_37 = arith.constant 2 : index
    %19 = vector.load %arg4[%c0_35, %c0_36, %c2_37] : memref<2x16x18xf32, #tpu.memory_space<vmem>>, vector<2x16x16xf32>
    %20 = arith.minimumf %18, %19 : vector<2x16x16xf32>
    %c0_38 = arith.constant 0 : index
    %c0_39 = arith.constant 0 : index
    %c0_40 = arith.constant 0 : index
    %21 = vector.load %arg2[%c0_38, %c0_39, %c0_40] : memref<2x16x16xf32, #tpu.memory_space<vmem>>, vector<2x16x16xf32>
    tpu.vector_store %arg2[%c0_38, %c0_39, %c0_40], %20 {strides = array<i32>} : memref<2x16x16xf32, #tpu.memory_space<vmem>>, vector<2x16x16xf32>,
    return
  }
  func.func @transform_0(%arg0: i32) -> (i32, i32, i32) {
    %c0_i32 = arith.constant 0 : i32
    %c0_i32_0 = arith.constant 0 : i32
    %c0_i32_1 = arith.constant 0 : i32
    return %arg0, %c0_i32, %c0_i32_0 : i32, i32, i32
  }
  func.func @transform_1(%arg0: i32) -> (i32, i32, i32) {
    %c0_i32 = arith.constant 0 : i32
    %c0_i32_0 = arith.constant 0 : i32
    %c0_i32_1 = arith.constant 0 : i32
    return %arg0, %c0_i32, %c0_i32_0 : i32, i32, i32
  }
}

</mosaic_0001>

<bundles_post_ra>
// kernel: tpu_custom_call.1
= control target key start
LH: loop header
LB: loop body
LE: loop exit
PB: predicated region body
PF: predicated region fallthrough
CT: control target
= control target key end

     0   :  { %6 = vsyncpa [#allocation5], 0  ;;  %s261_s0 = inlined_call_operand.hbm [shape: f32[2,16,16], index: 0, kind: input, shape index: {}]   ;;  %s262_s1 = inlined_call_operand.hbm [shape: f32[2,16,16], index: 1, kind: output, shape index: {}]  }
   0x1   :  { %7 = vsyncpa [#allocation6], 0  ;;  %s205_s6 = smov [#allocation4]   ;;  %s157_s10 = scalar_lea.hbm %s261_s0, 512 }
   0x2   :  { %s13_s7 = sshll.u32 %s205_s6, 4  ;;  %p158_p0 = scmp.ne.s32.totalorder %s261_s0, %s157_s10  ;;  %s14_s7 = int_to_ptr.vmem [resolvable:$true] %s13_s7 }
   0x3   :  { %p161_p1 = scmp.lt.u32.totalorder %s157_s10, %s261_s0 }
   0x5   :  { %p163_p2 = pnand %p161_p1, %p158_p0 }
   0x7   :  { %166 = shalt.err (!%p163_p2)
}
   0x8   :  { %s167_s15 = scalar_lea.vmem %s14_s7, 512  ;;  %p172_p4 = scmp.lt.s32.totalorder %s14_s7, %s14_s7 }
   0x9   :  { %p168_p3 = scmp.ne.s32.totalorder %s14_s7, %s167_s15  ;;  %p173_p5 = scmp.lt.s32.totalorder %s167_s15, %s167_s15 }
   0xb   :  { %p174_p6 = por %p173_p5, %p172_p4 }
   0xd   :  { %p175_p7 = pnand %p174_p6, %p168_p3 }
   0xf   :  { %178 = shalt.err (!%p175_p7)
}
  0x10   :  { %s206_s16 = smov 128   ;;  %s207_s17 = smov 8  }
  0x11   :  { %19 = dma.hbm_to_vmem [thread:$0]  %s261_s0, 512, %s14_s7, [#allocation5], %s206_s16, %s206_s16, %s207_s17  }
  0x12   :  { %201 = dma.done.wait [#allocation5], 512  }
  0x13   :  { %202 = vsyncadd [#allocation5], 4294966784  ;;  %vm23_vm0 = vcmask 122880   ;;  %v208_v0 = vmov inf   ;;  %vm57_vm1 = vcmask 7168   ;;  %vm62_vm2 = vcmask 146568  }
  0x14   :  { %24 = vst.msk [vmem:[#allocation2] sm:$0x1] %vm23_vm0, %v208_v0  ;;  %25 = vst.msk [vmem:[#allocation2 + $0x18] sm:$0x1] %vm23_vm0, %v208_v0  ;;  %vm32_vm3 = vcmask 130048   ;;  %v28_v1 = vld [vmem:[#allocation4] sm:$0xff] }
  0x15   :  { %26 = vst.msk [vmem:[#allocation2 + $0x11] sm:$0x1] %vm23_vm0, %v208_v0  ;;  %27 = vst.msk [vmem:[#allocation2 + $0x29] sm:$0x1] %vm23_vm0, %v208_v0  ;;  %v29_v2 = vld [vmem:[#allocation4 + $0x8] sm:$0xff]  ;;  %v30_v3 = vld [vmem:[#allocation4 + $0x10] sm:$0xff] }
  0x16   :  { %58 = vst.msk [vmem:[#allocation3] sm:$0xff] %vm57_vm1, %v208_v0  ;;  %59 = vst.msk [vmem:[#allocation3 + $0x8] sm:$0xff] %vm57_vm1, %v208_v0  ;;  %v31_v4 = vld [vmem:[#allocation4 + $0x18] sm:$0xff]  ;;  %s209_s0 = smov 1   ;;  %vm83_vm4 = vcmask 138248   ;;  %s210_s20 = smov 127  }
  0x17   :  { %60 = vst.msk [vmem:[#allocation3 + $0x10] sm:$0xff] %vm57_vm1, %v208_v0  ;;  %61 = vst.msk [vmem:[#allocation3 + $0x18] sm:$0xff] %vm57_vm1, %v208_v0  ;;  %s211_s21 = smov 126   ;;  %s212_s22 = smov [#allocation7]  }
  0x18   :  { %63 = vst.msk [vmem:[#allocation3] sm:$0xff] %vm62_vm2, %v208_v0  ;;  %65 = vst.msk [vmem:[#allocation3 + $0x10] sm:$0xff] %vm62_vm2, %v208_v0  ;;  %s137_s23 = sshll.u32 %s212_s22, 4  ;;  %s138_s23 = int_to_ptr.vmem [resolvable:$true] %s137_s23 }
  0x19   :  { %64 = vst.msk [vmem:[#allocation3 + $0x8] sm:$0xff] %vm62_vm2, %v208_v0  ;;  %66 = vst.msk [vmem:[#allocation3 + $0x18] sm:$0xff] %vm62_vm2, %v208_v0  ;;  %s179_s24 = scalar_lea.vmem %s138_s23, 512  ;;  %p184_p9 = scmp.lt.s32.totalorder %s138_s23, %s138_s23 }
  0x1a   :  { %33 = vst.msk [vmem:[#allocation2 + $0x1] sm:$0xff] %vm32_vm3, %v28_v1  ;;  %34 = vst.msk [vmem:[#allocation2 + $0x9] sm:$0xff] %vm32_vm3, %v29_v2  ;;  %p180_p8 = scmp.ne.s32.totalorder %s138_s23, %s179_s24  ;;  %p185_p10 = scmp.lt.s32.totalorder %s179_s24, %s179_s24 }
  0x1b   :  { %35 = vst.msk [vmem:[#allocation2 + $0x19] sm:$0xff] %vm32_vm3, %v30_v3  ;;  %36 = vst.msk [vmem:[#allocation2 + $0x21] sm:$0xff] %vm32_vm3, %v31_v4 }
  0x1c   :  { %p186_p11 = por %p185_p10, %p184_p9 }
  0x1e   :  { %p187_p12 = pnand %p186_p11, %p180_p8 }
  0x21   :  { %v37_v5 = vld [vmem:[#allocation2] sm:$0xff]  ;;  %v38_v13 = vld [vmem:[#allocation2 + $0x8] sm:$0xff] }
  0x22   :  { %v41_v6 = vld [vmem:[#allocation2 + $0x1] sm:$0xff]  ;;  %v39_v9 = vld [vmem:[#allocation2 + $0x18] sm:$0xff]  ;;  %v42_v14 = vld [vmem:[#allocation2 + $0x9] sm:$0xff] }
  0x23   :  { %v49_v7 = vld [vmem:[#allocation2 + $0x2] sm:$0xff]  ;;  %v45_v8 = vmin.f32 %v37_v5, %v41_v6  ;;  %v43_v10 = vld [vmem:[#allocation2 + $0x19] sm:$0xff]  ;;  %v50_v15 = vld [vmem:[#allocation2 + $0xa] sm:$0xff]  ;;  %v46_v17 = vmin.f32 %v38_v13, %v42_v14 }
  0x24   :  { %v51_v11 = vld [vmem:[#allocation2 + $0x1a] sm:$0xff]  ;;  %v47_v12 = vmin.f32 %v39_v9, %v43_v10  ;;  %v52_v20 = vld [vmem:[#allocation2 + $0x22] sm:$0xff] }
  0x25   :  { %v53_v16 = vmin.f32 %v45_v8, %v49_v7  ;;  %v40_v18 = vld [vmem:[#allocation2 + $0x20] sm:$0xff]  ;;  %v54_v23 = vmin.f32 %v46_v17, %v50_v15 }
  0x26   :  { %v44_v19 = vld [vmem:[#allocation2 + $0x21] sm:$0xff]  ;;  %v55_v21 = vmin.f32 %v47_v12, %v51_v11 }
  0x27   :  { %v48_v22 = vmin.f32 %v40_v18, %v44_v19  ;;  %71 = vrot.lane.b32.xlu0 %v53_v16, %s209_s0 }
  0x28   :  { %75 = vrot.lane.b32.xlu1 %v55_v21, %s209_s0 }
  0x29   :  { %v56_v24 = vmin.f32 %v48_v22, %v52_v20 }
  0x2b   :  { %73 = vrot.lane.b32.xlu0 %v54_v23, %s209_s0 }
  0x2c   :  { %77 = vrot.lane.b32.xlu1 %v56_v24, %s209_s0 }
  0x99   :  { %v72_v25 = vpop.permute.xlu0 %71 }
  0x9a   :  { %84 = vst.msk [vmem:[#allocation3] sm:$0xff] %vm83_vm4, %v72_v25  ;;  %v76_v26 = vpop.permute.xlu1 %75 }
  0x9b   :  { %86 = vst.msk [vmem:[#allocation3 + $0x10] sm:$0xff] %vm83_vm4, %v76_v26 }
  0x9d   :  { %v74_v27 = vpop.permute.xlu0 %73 }
  0x9e   :  { %85 = vst.msk [vmem:[#allocation3 + $0x8] sm:$0xff] %vm83_vm4, %v74_v27  ;;  %v78_v28 = vpop.permute.xlu1 %77 }
  0x9f   :  { %87 = vst.msk [vmem:[#allocation3 + $0x18] sm:$0xff] %vm83_vm4, %v78_v28 }
  0xa1   :  { %v88_v29 = vld [vmem:[#allocation3] sm:$0xff] }
  0xa2   :  { %96 = vrot.lane.b32.xlu0 %v88_v29, %s210_s20  ;;  %v90_v30 = vld [vmem:[#allocation3 + $0x10] sm:$0xff] }
  0xa5   :  { %v89_v31 = vld [vmem:[#allocation3 + $0x8] sm:$0xff] }
  0xa6   :  { %100 = vrot.lane.b32.xlu0 %v90_v30, %s210_s20  ;;  %98 = vrot.lane.b32.xlu1 %v89_v31, %s210_s20  ;;  %v91_v32 = vld [vmem:[#allocation3 + $0x18] sm:$0xff] }
  0xaa   :  { %112 = vrot.lane.b32.xlu0 %v88_v29, %s211_s21  ;;  %102 = vrot.lane.b32.xlu1 %v91_v32, %s210_s20 }
  0xae   :  { %116 = vrot.lane.b32.xlu0 %v90_v30, %s211_s21  ;;  %114 = vrot.lane.b32.xlu1 %v89_v31, %s211_s21 }
  0xb2   :  { %118 = vrot.lane.b32.xlu1 %v91_v32, %s211_s21 }
 0x114   :  { %v97_v33 = vpop.permute.xlu0 %96 }
 0x115   :  { %v108_v36 = vmin.f32 %v88_v29, %v97_v33 }
 0x118   :  { %v99_v34 = vpop.permute.xlu1 %98  ;;  %v101_v35 = vpop.permute.xlu0 %100 }
 0x119   :  { %v109_v40 = vmin.f32 %v89_v31, %v99_v34  ;;  %v110_v41 = vmin.f32 %v90_v30, %v101_v35 }
 0x11c   :  { %v103_v37 = vpop.permute.xlu1 %102  ;;  %v113_v38 = vpop.permute.xlu0 %112 }
 0x11d   :  { %v124_v39 = vmin.f32 %v108_v36, %v113_v38  ;;  %v111_v46 = vmin.f32 %v91_v32, %v103_v37 }
 0x11f   :  { %128 = vst.msk [vmem:[#allocation7] sm:$0xff] %vm32_vm3, %v124_v39 }
 0x120   :  { %v115_v42 = vpop.permute.xlu1 %114  ;;  %v117_v43 = vpop.permute.xlu0 %116 }
 0x121   :  { %v125_v44 = vmin.f32 %v109_v40, %v115_v42  ;;  %v126_v45 = vmin.f32 %v110_v41, %v117_v43 }
 0x123   :  { %129 = vst.msk [vmem:[#allocation7 + $0x8] sm:$0xff] %vm32_vm3, %v125_v44  ;;  %130 = vst.msk [vmem:[#allocation7 + $0x10] sm:$0xff] %vm32_vm3, %v126_v45 }
 0x124   :  { %v119_v47 = vpop.permute.xlu1 %118 }
 0x125   :  { %v127_v48 = vmin.f32 %v111_v46, %v119_v47 }
 0x127   :  { %131 = vst.msk [vmem:[#allocation7 + $0x18] sm:$0xff] %vm32_vm3, %v127_v48 }
 0x128   :  { %190 = shalt.err (!%p187_p12)
}
 0x129   :  { %s191_s27 = scalar_lea.hbm %s262_s1, 512 }
 0x12a   :  { %p192_p13 = scmp.ne.s32.totalorder %s262_s1, %s191_s27  ;;  %p195_p0 = scmp.lt.u32.totalorder %s191_s27, %s262_s1 }
 0x12c   :  { %p197_p1 = pnand %p195_p0, %p192_p13 }
 0x12e   :  { %200 = shalt.err (!%p197_p1)
}
 0x12f   :  { %143 = dma.vmem_to_hbm [thread:$0]  %s138_s23, 512, %s262_s1, [#allocation6], %s206_s16, %s206_s16, %s207_s17  }
 0x130   :  { %203 = dma.done.wait [#allocation6], 512  }
 0x131   :  { %204 = vsyncadd [#allocation6], 4294966784 }
 0x132   :  { %147 = vsyncpa [#allocation5], 1 }
 0x133   :  { %148 = vsyncpa [#allocation6], 1 }

</bundles_post_ra>
